<compile_context>
chip_gen: v7x
topology: tpu7x:2x2x1
jax: 0.10.0
libtpu: 0.0.40
codegen_flags: <defaults>
</compile_context>

<pallas_src>
import jax
import jax.numpy as jnp
from jax.experimental import pallas as pl
from jax.experimental.pallas import tpu as pltpu


def encoder_kernel(x_ref, w1_ref, b1_ref, w2_ref, b2_ref, w3_ref, b3_ref,
                   out_ref):
    # All activations are [features, batch_tile]: batch on the lane axis.
    x = x_ref[...]                                            # [in, tb]
    h1 = jnp.tanh(
        jnp.dot(w1_ref[...], x, preferred_element_type=jnp.float32)
        + b1_ref[...]
    )                                                         # [hid, tb]
    h2 = jnp.tanh(
        jnp.dot(w2_ref[...], h1, preferred_element_type=jnp.float32)
        + b2_ref[...]
    )                                                         # [hid, tb]
    # Final linear: single fused, lane-dense store of [2*latent, tb].
    out_ref[...] = (
        jnp.dot(w3_ref[...], h2, preferred_element_type=jnp.float32)
        + b3_ref[...]
    ).astype(out_ref.dtype)


def _batch_tile(B, max_tile):
    """Pick the batch (lane) tile size.

    Single full-extent block when B fits; otherwise an even number of grid
    steps (so v7x's two TensorCores split the parallel axis evenly) with the
    tile rounded up to a multiple of 128 (lane-dim block constraint).
    """
    if B <= max_tile:
        return B
    n_steps = -(-B // max_tile)
    if n_steps % 2:
        n_steps += 1
    tb = -(-B // n_steps)
    tb = ((tb + 127) // 128) * 128
    return tb


def encoder_forward(x, params, *, max_tile=8192):
    """x: [B, input_dim] float32.  params: (w1,b1,w2,b2,w3,b3) in PyTorch
    layout (W: [out_features, in_features], b: [out_features, 1]).

    Returns (mu_z, logsigma_z), each [B, latent_dim].
    """
    w1, b1, w2, b2, w3, b3 = params
    B, input_dim = x.shape
    hidden_dim = w1.shape[0]
    output_dim = w3.shape[0]
    latent_dim = output_dim // 2

    tb = _batch_tile(B, max_tile)
    grid = (pl.cdiv(B, tb),)

    # One layout change in the wrapper: batch onto the lane axis.
    x_t = x.T                                                 # [input_dim, B]

    out_t = pl.pallas_call(
        encoder_kernel,
        out_shape=jax.ShapeDtypeStruct((output_dim, B), jnp.float32),
        grid=grid,
        in_specs=[
            # x^T: lane-tiled over the batch grid axis.
            pl.BlockSpec((input_dim, tb), lambda i: (0, i)),
            # Weights / biases: constant index_map => VMEM-resident across steps.
            pl.BlockSpec((hidden_dim, input_dim), lambda i: (0, 0)),
            pl.BlockSpec((hidden_dim, 1), lambda i: (0, 0)),
            pl.BlockSpec((hidden_dim, hidden_dim), lambda i: (0, 0)),
            pl.BlockSpec((hidden_dim, 1), lambda i: (0, 0)),
            pl.BlockSpec((output_dim, hidden_dim), lambda i: (0, 0)),
            pl.BlockSpec((output_dim, 1), lambda i: (0, 0)),
        ],
        out_specs=pl.BlockSpec((output_dim, tb), lambda i: (0, i)),
        compiler_params=pltpu.CompilerParams(
            dimension_semantics=("parallel",),
        ),
    )(x_t, w1, b1, w2, b2, w3, b3)

    # Free XLA row-slice + transpose outside the kernel.
    mu_z = out_t[:latent_dim, :].T
    logsigma_z = out_t[latent_dim:, :].T
    return mu_z, logsigma_z


def init_params(key, input_dim, hidden_dim, latent_dim):
    """Deterministic synthetic parameters (mimics nn.Linear uniform init),
    stored in PyTorch orientation: W [out, in], b [out, 1]."""
    ks = jax.random.split(key, 6)

    def lin(kw, kb, fan_in, fan_out):
        bound = 1.0 / jnp.sqrt(fan_in)
        w = jax.random.uniform(kw, (fan_out, fan_in), jnp.float32, -bound, bound)
        b = jax.random.uniform(kb, (fan_out, 1), jnp.float32, -bound, bound)
        return w, b

    output_dim = 2 * latent_dim
    w1, b1 = lin(ks[0], ks[1], input_dim, hidden_dim)
    w2, b2 = lin(ks[2], ks[3], hidden_dim, hidden_dim)
    w3, b3 = lin(ks[4], ks[5], hidden_dim, output_dim)
    return (w1, b1, w2, b2, w3, b3)


def encoder_reference(x, params):
    w1, b1, w2, b2, w3, b3 = params
    h1 = jnp.tanh(x @ w1.T + b1.T)
    h2 = jnp.tanh(h1 @ w2.T + b2.T)
    out = h2 @ w3.T + b3.T
    latent_dim = w3.shape[0] // 2
    return out[:, :latent_dim], out[:, latent_dim:]


if __name__ == "__main__":
    # Small shapes consistent with the module: x is [batch, input_dim].
    batch, input_dim, hidden_dim, latent_dim = 8, 16, 32, 8

    key = jax.random.PRNGKey(0)
    kx, kp, kx2 = jax.random.split(key, 3)
    x = jax.random.normal(kx, (batch, input_dim), jnp.float32)
    params = init_params(kp, input_dim, hidden_dim, latent_dim)

    fwd = jax.jit(encoder_forward)

    # Small-batch path (single grid step, full-extent blocks).
    mu_z, logsigma_z = fwd(x, params)
    jax.block_until_ready((mu_z, logsigma_z))
    mu_ref, ls_ref = encoder_reference(x, params)
    assert mu_z.shape == (batch, latent_dim)
    assert logsigma_z.shape == (batch, latent_dim)
    assert jnp.allclose(mu_z, mu_ref, atol=1e-5, rtol=1e-5)
    assert jnp.allclose(logsigma_z, ls_ref, atol=1e-5, rtol=1e-5)

    # Larger-batch path: exercises the lane-tiled grid (even step count for
    # v7x's two TensorCores), VMEM-resident weights and a partial last tile.
    big_batch = 20000
    x_big = jax.random.normal(kx2, (big_batch, input_dim), jnp.float32)
    mu_b, ls_b = fwd(x_big, params)
    jax.block_until_ready((mu_b, ls_b))
    mu_b_ref, ls_b_ref = encoder_reference(x_big, params)
    assert mu_b.shape == (big_batch, latent_dim)
    assert jnp.allclose(mu_b, mu_b_ref, atol=1e-5, rtol=1e-5)
    assert jnp.allclose(ls_b, ls_b_ref, atol=1e-5, rtol=1e-5)

    print("KERNEL_OK")
</pallas_src>

<mosaic_0001>
module attributes {stable_mosaic.version = 11 : i64} {
  func.func @encoder_kernel(%arg0: i32, %arg1: memref<16x8xf32, #tpu.memory_space<vmem>>, %arg2: memref<32x16xf32, #tpu.memory_space<vmem>>, %arg3: memref<32x1xf32, #tpu.memory_space<vmem>>, %arg4: memref<32x32xf32, #tpu.memory_space<vmem>>, %arg5: memref<32x1xf32, #tpu.memory_space<vmem>>, %arg6: memref<16x32xf32, #tpu.memory_space<vmem>>, %arg7: memref<16x1xf32, #tpu.memory_space<vmem>>, %arg8: memref<16x8xf32, #tpu.memory_space<vmem>>) attributes {dimension_semantics = [#tpu.dimension_semantics<parallel>], iteration_bounds = array<i64: 1>, scalar_prefetch = 0 : i64, scratch_operands = 0 : i64, tpu.core_type = #tpu.core_type<tc>, window_params = [{transform_indices = @transform_0, window_bounds = array<i64: 16, 8>}, {pipeline_mode = #tpu.pipeline_mode<synchronous>, transform_indices = @transform_1, window_bounds = array<i64: 32, 16>}, {pipeline_mode = #tpu.pipeline_mode<synchronous>, transform_indices = @transform_2, window_bounds = array<i64: 32, 1>}, {pipeline_mode = #tpu.pipeline_mode<synchronous>, transform_indices = @transform_3, window_bounds = array<i64: 32, 32>}, {pipeline_mode = #tpu.pipeline_mode<synchronous>, transform_indices = @transform_4, window_bounds = array<i64: 32, 1>}, {pipeline_mode = #tpu.pipeline_mode<synchronous>, transform_indices = @transform_5, window_bounds = array<i64: 16, 32>}, {pipeline_mode = #tpu.pipeline_mode<synchronous>, transform_indices = @transform_6, window_bounds = array<i64: 16, 1>}, {transform_indices = @transform_7, window_bounds = array<i64: 16, 8>}]} {
    %c0 = arith.constant 0 : index
    %c0_0 = arith.constant 0 : index
    %0 = vector.load %arg1[%c0, %c0_0] : memref<16x8xf32, #tpu.memory_space<vmem>>, vector<16x8xf32>
    %c0_1 = arith.constant 0 : index
    %c0_2 = arith.constant 0 : index
    %1 = vector.load %arg2[%c0_1, %c0_2] : memref<32x16xf32, #tpu.memory_space<vmem>>, vector<32x16xf32>
    %cst = arith.constant dense<0.000000e+00> : vector<32x8xf32>
    %2 = tpu.matmul %1, %0, %cst {dimension_numbers = #tpu.dot_dimension_numbers<[1], [0], [0], [1], [0, 0, 1, 1], [], []>} : vector<32x16xf32>, vector<16x8xf32>, vector<32x8xf32> -> vector<32x8xf32>
    %c0_3 = arith.constant 0 : index
    %c0_4 = arith.constant 0 : index
    %3 = vector.load %arg3[%c0_3, %c0_4] : memref<32x1xf32, #tpu.memory_space<vmem>>, vector<32x1xf32>
    %4 = vector.broadcast %3 : vector<32x1xf32> to vector<32x8xf32>
    %5 = arith.addf %2, %4 : vector<32x8xf32>
    %6 = math.tanh %5 : vector<32x8xf32>
    %c0_5 = arith.constant 0 : index
    %c0_6 = arith.constant 0 : index
    %7 = vector.load %arg4[%c0_5, %c0_6] : memref<32x32xf32, #tpu.memory_space<vmem>>, vector<32x32xf32>
    %cst_7 = arith.constant dense<0.000000e+00> : vector<32x8xf32>
    %8 = tpu.matmul %7, %6, %cst_7 {dimension_numbers = #tpu.dot_dimension_numbers<[1], [0], [0], [1], [0, 0, 1, 1], [], []>} : vector<32x32xf32>, vector<32x8xf32>, vector<32x8xf32> -> vector<32x8xf32>
    %c0_8 = arith.constant 0 : index
    %c0_9 = arith.constant 0 : index
    %9 = vector.load %arg5[%c0_8, %c0_9] : memref<32x1xf32, #tpu.memory_space<vmem>>, vector<32x1xf32>
    %10 = vector.broadcast %9 : vector<32x1xf32> to vector<32x8xf32>
    %11 = arith.addf %8, %10 : vector<32x8xf32>
    %12 = math.tanh %11 : vector<32x8xf32>
    %c0_10 = arith.constant 0 : index
    %c0_11 = arith.constant 0 : index
    %13 = vector.load %arg6[%c0_10, %c0_11] : memref<16x32xf32, #tpu.memory_space<vmem>>, vector<16x32xf32>
    %cst_12 = arith.constant dense<0.000000e+00> : vector<16x8xf32>
    %14 = tpu.matmul %13, %12, %cst_12 {dimension_numbers = #tpu.dot_dimension_numbers<[1], [0], [0], [1], [0, 0, 1, 1], [], []>} : vector<16x32xf32>, vector<32x8xf32>, vector<16x8xf32> -> vector<16x8xf32>
    %c0_13 = arith.constant 0 : index
    %c0_14 = arith.constant 0 : index
    %15 = vector.load %arg7[%c0_13, %c0_14] : memref<16x1xf32, #tpu.memory_space<vmem>>, vector<16x1xf32>
    %16 = vector.broadcast %15 : vector<16x1xf32> to vector<16x8xf32>
    %17 = arith.addf %14, %16 : vector<16x8xf32>
    %c0_15 = arith.constant 0 : index
    %c0_16 = arith.constant 0 : index
    %18 = vector.load %arg8[%c0_15, %c0_16] : memref<16x8xf32, #tpu.memory_space<vmem>>, vector<16x8xf32>
    tpu.vector_store %arg8[%c0_15, %c0_16], %17 {strides = array<i32>} : memref<16x8xf32, #tpu.memory_space<vmem>>, vector<16x8xf32>,
    return
  }
  func.func @transform_0(%arg0: i32) -> (i32, i32) {
    %c0_i32 = arith.constant 0 : i32
    %c0_i32_0 = arith.constant 0 : i32
    return %c0_i32, %arg0 : i32, i32
  }
  func.func @transform_1(%arg0: i32) -> (i32, i32) {
    %c0_i32 = arith.constant 0 : i32
    %c0_i32_0 = arith.constant 0 : i32
    %c0_i32_1 = arith.constant 0 : i32
    return %c0_i32, %c0_i32_0 : i32, i32
  }
  func.func @transform_2(%arg0: i32) -> (i32, i32) {
    %c0_i32 = arith.constant 0 : i32
    %c0_i32_0 = arith.constant 0 : i32
    %c0_i32_1 = arith.constant 0 : i32
    return %c0_i32, %c0_i32_0 : i32, i32
  }
  func.func @transform_3(%arg0: i32) -> (i32, i32) {
    %c0_i32 = arith.constant 0 : i32
    %c0_i32_0 = arith.constant 0 : i32
    %c0_i32_1 = arith.constant 0 : i32
    return %c0_i32, %c0_i32_0 : i32, i32
  }
  func.func @transform_4(%arg0: i32) -> (i32, i32) {
    %c0_i32 = arith.constant 0 : i32
    %c0_i32_0 = arith.constant 0 : i32
    %c0_i32_1 = arith.constant 0 : i32
    return %c0_i32, %c0_i32_0 : i32, i32
  }
  func.func @transform_5(%arg0: i32) -> (i32, i32) {
    %c0_i32 = arith.constant 0 : i32
    %c0_i32_0 = arith.constant 0 : i32
    %c0_i32_1 = arith.constant 0 : i32
    return %c0_i32, %c0_i32_0 : i32, i32
  }
  func.func @transform_6(%arg0: i32) -> (i32, i32) {
    %c0_i32 = arith.constant 0 : i32
    %c0_i32_0 = arith.constant 0 : i32
    %c0_i32_1 = arith.constant 0 : i32
    return %c0_i32, %c0_i32_0 : i32, i32
  }
  func.func @transform_7(%arg0: i32) -> (i32, i32) {
    %c0_i32 = arith.constant 0 : i32
    %c0_i32_0 = arith.constant 0 : i32
    return %c0_i32, %arg0 : i32, i32
  }
}

</mosaic_0001>

<bundles_post_ra>
// kernel: encoder_forward.1
= control target key start
LH: loop header
LB: loop body
LE: loop exit
PB: predicated region body
PF: predicated region fallthrough
CT: control target
= control target key end

     0   :  { %vm56_vm0 = vcmask 130048   ;;  %v494_v3 = vmov 0   ;;  %vm186_vm1 = vcmask 261120   ;;  %vm383_vm2 = vcmask 64512   ;;  %s617_s0 = inlined_call_operand.vmem [shape: f32[16,8], index: 0, kind: input, shape index: {}]   ;;  %s618_s1 = inlined_call_operand.vmem [shape: f32[32,16], index: 1, kind: input, shape index: {}]   ;;  %s619_s2 = inlined_call_operand.vmem [shape: f32[32,1], index: 2, kind: input, shape index: {}]   ;;  %s620_s4 = inlined_call_operand.vmem [shape: f32[32,1], index: 4, kind: input, shape index: {}]   ;;  %s621_s6 = inlined_call_operand.vmem [shape: f32[16,1], index: 6, kind: input, shape index: {}]   ;;  %s622_s3 = inlined_call_operand.vmem [shape: f32[32,32], index: 3, kind: input, shape index: {}]   ;;  %s623_s5 = inlined_call_operand.vmem [shape: f32[16,32], index: 5, kind: input, shape index: {}]   ;;  %s624_s7 = inlined_call_operand.vmem [shape: f32[16,8], index: 7, kind: output, shape index: {}]  }
   0x1   :  { %v26_v0 = vld [vmem:[%s617_s0] sm:$0xff]  ;;  %v27_v1 = vld [vmem:[%s617_s0 + $0x8] sm:$0xff]  ;;  %476 = vset.pattern.permute.xlu0 %v494_v3  ;;  %477 = vset.pattern.permute.xlu1 %v494_v3  ;;  %v34_v6 = vld [vmem:[%s619_s2 + $0x10] sm:$0xff] }
   0x2   :  { %v28_v2 = vld [vmem:[%s618_s1] sm:$0xff]  ;;  %v455_v4 = vpack.c.bf16 %v27_v1, %v26_v0  ;;  %v29_v7 = vld [vmem:[%s618_s1 + $0x8] sm:$0xff]  ;;  %48 = vperm.xlu1 %477, %v34_v6   ;;  %v30_v9 = vld [vmem:[%s618_s1 + $0x10] sm:$0xff] }
   0x3   :  { %424 = vmatprep.mubr.msk.f32.mxu0 %vm56_vm0, %v28_v2  ;;  %v32_v5 = vld [vmem:[%s619_s2] sm:$0xff]  ;;  %v33_v8 = vld [vmem:[%s619_s2 + $0x8] sm:$0xff]  ;;  %v35_v10 = vld [vmem:[%s619_s2 + $0x18] sm:$0xff] }
   0x4   :  { %456 = vmatprep.subr.bf16.mxu0 %v455_v4  ;;  %38 = vperm.xlu0 %476, %v32_v5   ;;  %v31_v11 = vld [vmem:[%s618_s1 + $0x18] sm:$0xff]  ;;  %v162_v12 = vld [vmem:[%s620_s4] sm:$0xff]  ;;  %v163_v13 = vld [vmem:[%s620_s4 + $0x8] sm:$0xff] }
   0x5   :  { %458 = vmatpush3.bf16.msra.mxu0 %v455_v4  ;;  %v164_v14 = vld [vmem:[%s620_s4 + $0x10] sm:$0xff]  ;;  %v165_v15 = vld [vmem:[%s620_s4 + $0x18] sm:$0xff]  ;;  %v290_v16 = vld [vmem:[%s621_s6] sm:$0xff] }
   0x6   :  { %53 = vperm.xlu1 %477, %v35_v10   ;;  %v291_v17 = vld [vmem:[%s621_s6 + $0x8] sm:$0xff]  ;;  %v158_v18 = vld [vmem:[%s622_s3] sm:$0xff]  ;;  %v160_v38 = vld [vmem:[%s622_s3 + $0x10] sm:$0xff] }
   0x7   :  { %438 = vmatprep.mubr.msk.f32.mxu1 %vm186_vm1, %v158_v18  ;;  %v159_v37 = vld [vmem:[%s622_s3 + $0x8] sm:$0xff]  ;;  %v161_v39 = vld [vmem:[%s622_s3 + $0x18] sm:$0xff]  ;;  %v288_v40 = vld [vmem:[%s623_s5] sm:$0xff] }
   0x8   :  { %425 = vmatmul.mubr.msk.f32.vlgmr.msra.gmra.mrb[0].mxu0 %vm56_vm0, %v29_v7  ;;  %43 = vperm.xlu0 %476, %v33_v8   ;;  %v289_v59 = vld [vmem:[%s623_s5 + $0x8] sm:$0xff] }
   0x9   :  { %427 = vmatprep.mubr.msk.f32.mxu0 %vm56_vm0, %v30_v9 }
   0xa   :  { %173 = vperm.xlu1 %477, %v163_v13  }
   0xc   :  { %428 = vmatmul.mubr.msk.f32.gmra.mrb[2].mxu0 %vm56_vm0, %v31_v11  ;;  %168 = vperm.xlu0 %476, %v162_v12  }
   0xd   :  { %452 = vmatprep.mubr.msk.f32.mxu0 %vm186_vm1, %v288_v40 }
   0xe   :  { %183 = vperm.xlu1 %477, %v165_v15  }
  0x10   :  { %178 = vperm.xlu0 %476, %v164_v14  }
  0x12   :  { %299 = vperm.xlu1 %477, %v291_v17  }
  0x14   :  { %294 = vperm.xlu0 %476, %v290_v16  }
  0x81   :  { %v49_v20 = vpop.permute.xlu1 %48 }
  0x83   :  { %v39_v19 = vpop.permute.xlu0 %38 }
  0x85   :  { %v54_v26 = vpop.permute.xlu1 %53 }
  0x87   :  { %v44_v21 = vpop.permute.xlu0 %43 }
  0x89   :  { %v174_v41 = vpop.permute.xlu1 %173 }
  0x8b   :  { %v169_v42 = vpop.permute.xlu0 %168 }
  0x8d   :  { %v184_v47 = vpop.permute.xlu1 %183 }
  0x8f   :  { %v179_v49 = vpop.permute.xlu0 %178 }
  0x91   :  { %v300_v60 = vpop.permute.xlu1 %299 }
  0x93   :  { %v295_v62 = vpop.permute.xlu0 %294 }
  0xdb   :  { %v426_v22 = vpop.f32.mrb[0].mxu0 }
  0xdc   :  { %v141_v23 = vadd.f32 %v426_v22, %v44_v21  ;;  %v135_v24 = vpop.f32.mrb[1].mxu0 }
  0xdd   :  { %v136_v25 = vadd.f32 %v135_v24, %v39_v19 }
  0xde   :  { %478 = vtanh.f32 %v141_v23 }
  0xdf   :  { %480 = vtanh.f32 %v136_v25  ;;  %v429_v27 = vpop.f32.mrb[2].mxu0 }
  0xe0   :  { %v151_v28 = vadd.f32 %v429_v27, %v54_v26  ;;  %v145_v29 = vpop.f32.mrb[3].mxu0 }
  0xe1   :  { %v146_v30 = vadd.f32 %v145_v29, %v49_v20 }
  0xe2   :  { %482 = vtanh.f32 %v151_v28 }
  0xe3   :  { %484 = vtanh.f32 %v146_v30 }
  0xe8   :  { %v479_v31 = vpop.eup %478 }
  0xe9   :  { %v481_v32 = vpop.eup %480 }
  0xea   :  { %v459_v33 = vpack.c.bf16 %v479_v31, %v481_v32 }
  0xec   :  { %v483_v34 = vpop.eup %482  ;;  %460 = vmatprep.subr.bf16.mxu1 %v459_v33 }
  0xed   :  { %v485_v35 = vpop.eup %484  ;;  %462 = vmatpush3.bf16.msra.mxu1 %v459_v33 }
  0xee   :  { %v463_v36 = vpack.c.bf16 %v483_v34, %v485_v35 }
  0xf0   :  { %464 = vmatprep.subr.bf16.mxu1 %v463_v36 }
  0xf1   :  { %466 = vmatpush3.bf16.msra.mxu1 %v463_v36 }
  0xf4   :  { %439 = vmatmul.mubr.msk.f32.vlgmr.msra.gmra.mrb[0].mxu1 %vm186_vm1, %v159_v37 }
  0xf5   :  { %441 = vmatprep.mubr.msk.f32.mxu1 %vm186_vm1, %v160_v38 }
  0xf8   :  { %442 = vmatmul.mubr.msk.f32.gmra.mrb[2].mxu1 %vm186_vm1, %v161_v39 }
 0x1c7   :  { %v440_v43 = vpop.f32.mrb[0].mxu1 }
 0x1c8   :  { %v271_v44 = vadd.f32 %v440_v43, %v174_v41  ;;  %v265_v45 = vpop.f32.mrb[1].mxu1 }
 0x1c9   :  { %v266_v46 = vadd.f32 %v265_v45, %v169_v42 }
 0x1ca   :  { %486 = vtanh.f32 %v271_v44 }
 0x1cb   :  { %488 = vtanh.f32 %v266_v46  ;;  %v443_v48 = vpop.f32.mrb[2].mxu1 }
 0x1cc   :  { %v281_v50 = vadd.f32 %v443_v48, %v184_v47  ;;  %v275_v51 = vpop.f32.mrb[3].mxu1 }
 0x1cd   :  { %v276_v52 = vadd.f32 %v275_v51, %v179_v49 }
 0x1ce   :  { %490 = vtanh.f32 %v281_v50 }
 0x1cf   :  { %492 = vtanh.f32 %v276_v52 }
 0x1d4   :  { %v487_v53 = vpop.eup %486 }
 0x1d5   :  { %v489_v54 = vpop.eup %488 }
 0x1d6   :  { %v467_v55 = vpack.c.bf16 %v487_v53, %v489_v54 }
 0x1d8   :  { %v491_v56 = vpop.eup %490  ;;  %468 = vmatprep.subr.bf16.mxu0 %v467_v55 }
 0x1d9   :  { %v493_v57 = vpop.eup %492  ;;  %470 = vmatpush3.bf16.msra.mxu0 %v467_v55 }
 0x1da   :  { %v471_v58 = vpack.c.bf16 %v491_v56, %v493_v57 }
 0x1dc   :  { %472 = vmatprep.subr.bf16.mxu0 %v471_v58 }
 0x1dd   :  { %474 = vmatpush3.bf16.msra.mxu0 %v471_v58 }
 0x1e0   :  { %453 = vmatmul.mubr.msk.f32.vlgmr.msra.gmra.mrb[4].mxu0 %vm186_vm1, %v289_v59 }
 0x2b3   :  { %v454_v61 = vpop.f32.mrb[4].mxu0 }
 0x2b4   :  { %v380_v63 = vadd.f32 %v454_v61, %v300_v60  ;;  %v374_v0 = vpop.f32.mrb[5].mxu0 }
 0x2b5   :  { %v375_v1 = vadd.f32 %v374_v0, %v295_v62 }
 0x2b6   :  { %385 = vst.msk [vmem:[%s624_s7 + $0x8] sm:$0xff] %vm383_vm2, %v380_v63 }
 0x2b7   :  { %384 = vst.msk [vmem:[%s624_s7] sm:$0xff] %vm383_vm2, %v375_v1 }

</bundles_post_ra>
